<compile_context>
chip_gen: v6e
topology: v6e:2x2x1
jax: 0.10.0
libtpu: 0.0.40
codegen_flags: <defaults>
</compile_context>

<pallas_src>
import functools

import numpy as np
import jax
import jax.numpy as jnp
from jax.experimental import pallas as pl
from jax.experimental.pallas import tpu as pltpu


def conv1x1_kernel(w_ref, x_ref, o_ref):
    # w_ref: (C_out, C_in) f32, x_ref: (C_in, HW) f32, o_ref: (C_out, HW) f32.
    # Cast to bf16 in-kernel (free on the VPU), accumulate in f32 on the MXU.
    o_ref[...] = jnp.dot(
        w_ref[...].astype(jnp.bfloat16),
        x_ref[...].astype(jnp.bfloat16),
        preferred_element_type=jnp.float32,
    ).astype(o_ref.dtype)


def conv1x1_batched_kernel(w_ref, x_ref, o_ref):
    # w_ref: (C_out, C_in) f32, x_ref: (B, C_in, HW) f32, o_ref: (B, C_out, HW) f32.
    w = w_ref[...].astype(jnp.bfloat16)
    # B is static (block shape); unrolled Python loop keeps each matmul a plain
    # 2-D MXU dot and avoids any (o,b,x)->(b,o,x) in-kernel transpose.
    for b in range(x_ref.shape[0]):
        o_ref[b] = jnp.dot(
            w, x_ref[b].astype(jnp.bfloat16),
            preferred_element_type=jnp.float32,
        ).astype(o_ref.dtype)


def _pick_batch_block(n):
    """Images per grid step: divides n, <= 16 (safe for v7x 64 MiB VMEM with
    double buffering), and keeps >= 2 grid steps when n > 1 (dual-TC v7x)."""
    if n <= 1:
        return 1
    cap = min(16, max(1, n // 2))
    for b in range(cap, 0, -1):
        if n % b == 0:
            return b
    return 1


@jax.jit
def conv1x1(x_nchw, weight_oihw):
    """1x1 conv, stride 1, no bias. x: (N, C_in, H, W) f32, weight: (C_out, C_in, 1, 1) f32."""
    N, C_in, H, W = x_nchw.shape
    C_out = weight_oihw.shape[0]
    HW = H * W
    out_dtype = x_nchw.dtype

    # Free reshapes only (no transposes, no dtype casts in the wrapper).
    x_flat = x_nchw.reshape(N, C_in, HW)
    w_mat = weight_oihw.reshape(C_out, C_in)

    itemsize = np.dtype(out_dtype).itemsize  # f32 in and out
    cost = pl.CostEstimate(
        flops=2 * N * HW * C_in * C_out,
        transcendentals=0,
        bytes_accessed=(x_flat.size + w_mat.size + N * C_out * HW) * itemsize,
    )

    if N == 1:
        # Single-shot call: whole problem (~0.5 MiB in f32) fits trivially in
        # VMEM.  No grid, no pipelining overhead, no pointless double buffering.
        out_flat = pl.pallas_call(
            conv1x1_kernel,
            out_shape=jax.ShapeDtypeStruct((C_out, HW), out_dtype),
            in_specs=[
                pl.BlockSpec(memory_space=pltpu.MemorySpace.VMEM),
                pl.BlockSpec(memory_space=pltpu.MemorySpace.VMEM),
            ],
            out_specs=pl.BlockSpec(memory_space=pltpu.MemorySpace.VMEM),
            cost_estimate=cost,
        )(w_mat, x_flat.reshape(C_in, HW))
        out_flat = out_flat[None]
    else:
        # Batched path: B images per grid step to amortize per-step overhead;
        # "parallel" lets megacore / v7x dual-TC shard the (>=2-step) grid.
        B = _pick_batch_block(N)
        out_flat = pl.pallas_call(
            conv1x1_batched_kernel,
            out_shape=jax.ShapeDtypeStruct((N, C_out, HW), out_dtype),
            grid=(N // B,),
            in_specs=[
                pl.BlockSpec((C_out, C_in), lambda n: (0, 0)),
                pl.BlockSpec((B, C_in, HW), lambda n: (n, 0, 0)),
            ],
            out_specs=pl.BlockSpec((B, C_out, HW), lambda n: (n, 0, 0)),
            compiler_params=pltpu.CompilerParams(
                dimension_semantics=("parallel",)),
            cost_estimate=cost,
        )(w_mat, x_flat)

    # (N, C_out, H*W) -> (N, C_out, H, W): free reshape, already channel-major.
    return out_flat.reshape(N, C_out, H, W)


def _check(x, weight):
    out = jax.block_until_ready(conv1x1(x, weight))
    assert out.shape == (x.shape[0], weight.shape[0], x.shape[2], x.shape[3])
    assert out.dtype == jnp.float32

    w2d = weight.reshape(weight.shape[0], weight.shape[1])
    # Tight check vs. a reference using the same bf16 operands / f32 accumulate.
    ref_bf = jnp.einsum(
        "nchw,oc->nohw",
        x.astype(jnp.bfloat16), w2d.astype(jnp.bfloat16),
        preferred_element_type=jnp.float32,
    )
    assert jnp.allclose(out, ref_bf, atol=1e-3, rtol=1e-3)
    # Loose check vs. full-f32 reference (difference = bf16 operand quantization).
    ref_f32 = jnp.einsum("nchw,oc->nohw", x, w2d)
    assert jnp.allclose(out, ref_f32, atol=1e-1, rtol=1e-1)


if __name__ == "__main__":
    key = jax.random.PRNGKey(0)
    kx, kw, kx2 = jax.random.split(key, 3)

    # Shapes from the module: input (1, 480, 14, 14), Conv2d(480, 80, 1x1, bias=False)
    weight = jax.random.normal(kw, (80, 480, 1, 1), dtype=jnp.float32) * 0.05

    # N == 1 single-shot path (the module's actual shape).
    x1 = jax.random.normal(kx, (1, 480, 14, 14), dtype=jnp.float32)
    _check(x1, weight)

    # N > 1 batched path (exercises the B-per-step grid; N=4 -> B=2, grid=2).
    x4 = jax.random.normal(kx2, (4, 480, 14, 14), dtype=jnp.float32)
    _check(x4, weight)

    print("KERNEL_OK")
</pallas_src>

<mosaic_0001>
module attributes {stable_mosaic.version = 11 : i64} {
  func.func @conv1x1_kernel(%arg0: memref<80x480xf32, #tpu.memory_space<vmem>>, %arg1: memref<480x196xf32, #tpu.memory_space<vmem>>, %arg2: memref<80x196xf32, #tpu.memory_space<vmem>>) attributes {dimension_semantics = [], scalar_prefetch = 0 : i64, scratch_operands = 0 : i64, tpu.core_type = #tpu.core_type<tc>} {
    %c0 = arith.constant 0 : index
    %c0_0 = arith.constant 0 : index
    %0 = vector.load %arg0[%c0, %c0_0] : memref<80x480xf32, #tpu.memory_space<vmem>>, vector<80x480xf32>
    %1 = arith.truncf %0 : vector<80x480xf32> to vector<80x480xbf16>
    %c0_1 = arith.constant 0 : index
    %c0_2 = arith.constant 0 : index
    %2 = vector.load %arg1[%c0_1, %c0_2] : memref<480x196xf32, #tpu.memory_space<vmem>>, vector<480x196xf32>
    %3 = arith.truncf %2 : vector<480x196xf32> to vector<480x196xbf16>
    %cst = arith.constant dense<0.000000e+00> : vector<80x196xf32>
    %4 = tpu.matmul %1, %3, %cst {dimension_numbers = #tpu.dot_dimension_numbers<[1], [0], [0], [1], [0, 0, 1, 1], [], []>} : vector<80x480xbf16>, vector<480x196xbf16>, vector<80x196xf32> -> vector<80x196xf32>
    %c0_3 = arith.constant 0 : index
    %c0_4 = arith.constant 0 : index
    %5 = vector.load %arg2[%c0_3, %c0_4] : memref<80x196xf32, #tpu.memory_space<vmem>>, vector<80x196xf32>
    tpu.vector_store %arg2[%c0_3, %c0_4], %4 {strides = array<i32>} : memref<80x196xf32, #tpu.memory_space<vmem>>, vector<80x196xf32>,
    return
  }
}

</mosaic_0001>

<bundles_post_ra>
// kernel: conv1x1.1
= control target key start
LH: loop header
LB: loop body
LE: loop exit
PB: predicated region body
PF: predicated region fallthrough
CT: control target
= control target key end

     0   :  { %vm252_vm0 = vcmask 785408   ;;  %vm435_vm1 = vcmask 556032   ;;  %s1034_s1 = inlined_call_operand.vmem [shape: f32[480,196], index: 1, kind: input, shape index: {}]   ;;  %s1035_s0 = inlined_call_operand.vmem [shape: f32[80,480], index: 0, kind: input, shape index: {}]   ;;  %s1036_s2 = inlined_call_operand.vmem [shape: f32[80,196], index: 2, kind: output, shape index: {}]  }
   0x1   :  { %v101_v0 = vld [vmem:[%s1034_s1 + $0xe8] sm:$0xff]  ;;  %v103_v1 = vld [vmem:[%s1034_s1 + $0xf8] sm:$0xff]  ;;  %v100_v2 = vld [vmem:[%s1034_s1 + $0xe0] sm:$0xff] }
   0x2   :  { %v207_v3 = vpack.c.bf16 %v103_v1, %v101_v0  ;;  %v102_v4 = vld [vmem:[%s1034_s1 + $0xf0] sm:$0xff]  ;;  %v165_v5 = vld [vmem:[%s1034_s1 + $0x2e8] sm:$0xff]  ;;  %v167_v6 = vld [vmem:[%s1034_s1 + $0x2f8] sm:$0xff] }
   0x3   :  { %v206_v7 = vpack.c.bf16 %v102_v4, %v100_v2  ;;  %v239_v8 = vpack.c.bf16 %v167_v6, %v165_v5  ;;  %v164_v9 = vld [vmem:[%s1034_s1 + $0x2e0] sm:$0xff]  ;;  %v166_v10 = vld [vmem:[%s1034_s1 + $0x2f0] sm:$0xff]  ;;  %v97_v11 = vld [vmem:[%s1034_s1 + $0xc8] sm:$0xff] }
   0x4   :  { %268 = vmatprep.subr.bf16.mxu0 %v207_v3  ;;  %v238_v12 = vpack.c.bf16 %v166_v10, %v164_v9  ;;  %v99_v13 = vld [vmem:[%s1034_s1 + $0xd8] sm:$0xff]  ;;  %v96_v14 = vld [vmem:[%s1034_s1 + $0xc0] sm:$0xff]  ;;  %v98_v15 = vld [vmem:[%s1034_s1 + $0xd0] sm:$0xff] }
   0x5   :  { %269 = vmatpush1.bf16.msra.mxu0 %v206_v7  ;;  %351 = vmatprep.subr.bf16.mxu1 %v239_v8  ;;  %v205_v16 = vpack.c.bf16 %v99_v13, %v97_v11  ;;  %v204_v17 = vpack.c.bf16 %v98_v15, %v96_v14  ;;  %v161_v18 = vld [vmem:[%s1034_s1 + $0x2c8] sm:$0xff]  ;;  %v163_v19 = vld [vmem:[%s1034_s1 + $0x2d8] sm:$0xff]  ;;  %v160_v20 = vld [vmem:[%s1034_s1 + $0x2c0] sm:$0xff] }
   0x6   :  { %352 = vmatpush1.bf16.msra.mxu1 %v238_v12  ;;  %v237_v21 = vpack.c.bf16 %v163_v19, %v161_v18  ;;  %v162_v22 = vld [vmem:[%s1034_s1 + $0x2d0] sm:$0xff]  ;;  %v93_v23 = vld [vmem:[%s1034_s1 + $0xa8] sm:$0xff]  ;;  %v95_v24 = vld [vmem:[%s1034_s1 + $0xb8] sm:$0xff] }
   0x7   :  { %270 = vmatprep.subr.bf16.mxu0 %v205_v16  ;;  %v236_v25 = vpack.c.bf16 %v162_v22, %v160_v20  ;;  %v203_v26 = vpack.c.bf16 %v95_v24, %v93_v23  ;;  %v92_v27 = vld [vmem:[%s1034_s1 + $0xa0] sm:$0xff]  ;;  %v94_v28 = vld [vmem:[%s1034_s1 + $0xb0] sm:$0xff]  ;;  %v157_v29 = vld [vmem:[%s1034_s1 + $0x2a8] sm:$0xff] }
   0x8   :  { %353 = vmatprep.subr.bf16.mxu1 %v237_v21  ;;  %v159_v30 = vld [vmem:[%s1034_s1 + $0x2b8] sm:$0xff]  ;;  %v156_v31 = vld [vmem:[%s1034_s1 + $0x2a0] sm:$0xff]  ;;  %v158_v32 = vld [vmem:[%s1034_s1 + $0x2b0] sm:$0xff]  ;;  %v202_v33 = vpack.c.bf16 %v94_v28, %v92_v27 }
   0x9   :  { %271 = vmatpush1.bf16.msra.mxu0 %v204_v17  ;;  %v235_v34 = vpack.c.bf16 %v159_v30, %v157_v29  ;;  %v89_v35 = vld [vmem:[%s1034_s1 + $0x88] sm:$0xff]  ;;  %v91_v36 = vld [vmem:[%s1034_s1 + $0x98] sm:$0xff]  ;;  %v88_v37 = vld [vmem:[%s1034_s1 + $0x80] sm:$0xff]  ;;  %v234_v38 = vpack.c.bf16 %v158_v32, %v156_v31 }
   0xa   :  { %354 = vmatpush1.bf16.msra.mxu1 %v236_v25  ;;  %272 = vmatprep.subr.bf16.mxu0 %v203_v26  ;;  %v201_v39 = vpack.c.bf16 %v91_v36, %v89_v35  ;;  %v90_v40 = vld [vmem:[%s1034_s1 + $0x90] sm:$0xff]  ;;  %v153_v41 = vld [vmem:[%s1034_s1 + $0x288] sm:$0xff]  ;;  %v155_v42 = vld [vmem:[%s1034_s1 + $0x298] sm:$0xff] }
   0xb   :  { %355 = vmatprep.subr.bf16.mxu1 %v235_v34  ;;  %v233_v43 = vpack.c.bf16 %v155_v42, %v153_v41  ;;  %v152_v44 = vld [vmem:[%s1034_s1 + $0x280] sm:$0xff]  ;;  %v154_v45 = vld [vmem:[%s1034_s1 + $0x290] sm:$0xff]  ;;  %v85_v46 = vld [vmem:[%s1034_s1 + $0x68] sm:$0xff]  ;;  %v200_v48 = vpack.c.bf16 %v90_v40, %v88_v37 }
   0xc   :  { %v87_v47 = vld [vmem:[%s1034_s1 + $0x78] sm:$0xff]  ;;  %v149_v49 = vld [vmem:[%s1034_s1 + $0x268] sm:$0xff]  ;;  %v232_v51 = vpack.c.bf16 %v154_v45, %v152_v44  ;;  %v84_v53 = vld [vmem:[%s1034_s1 + $0x60] sm:$0xff] }
   0xd   :  { %273 = vmatpush1.bf16.msra.mxu0 %v202_v33  ;;  %v151_v50 = vld [vmem:[%s1034_s1 + $0x278] sm:$0xff]  ;;  %v199_v52 = vpack.c.bf16 %v87_v47, %v85_v46  ;;  %v86_v54 = vld [vmem:[%s1034_s1 + $0x70] sm:$0xff]  ;;  %v148_v55 = vld [vmem:[%s1034_s1 + $0x260] sm:$0xff] }
   0xe   :  { %356 = vmatpush1.bf16.msra.mxu1 %v234_v38  ;;  %274 = vmatprep.subr.bf16.mxu0 %v201_v39  ;;  %v231_v56 = vpack.c.bf16 %v151_v50, %v149_v49  ;;  %v150_v57 = vld [vmem:[%s1034_s1 + $0x270] sm:$0xff]  ;;  %v81_v58 = vld [vmem:[%s1034_s1 + $0x48] sm:$0xff]  ;;  %v83_v59 = vld [vmem:[%s1034_s1 + $0x58] sm:$0xff]  ;;  %v198_v62 = vpack.c.bf16 %v86_v54, %v84_v53 }
   0xf   :  { %357 = vmatprep.subr.bf16.mxu1 %v233_v43  ;;  %v145_v60 = vld [vmem:[%s1034_s1 + $0x248] sm:$0xff]  ;;  %v147_v61 = vld [vmem:[%s1034_s1 + $0x258] sm:$0xff]  ;;  %v230_v63 = vpack.c.bf16 %v150_v57, %v148_v55  ;;  %v197_v0 = vpack.c.bf16 %v83_v59, %v81_v58  ;;  %v80_v1 = vld [vmem:[%s1034_s1 + $0x40] sm:$0xff] }
  0x10   :  { %v82_v2 = vld [vmem:[%s1034_s1 + $0x50] sm:$0xff]  ;;  %v144_v3 = vld [vmem:[%s1034_s1 + $0x240] sm:$0xff]  ;;  %v229_v4 = vpack.c.bf16 %v147_v61, %v145_v60  ;;  %v77_v6 = vld [vmem:[%s1034_s1 + $0x28] sm:$0xff] }
  0x11   :  { %275 = vmatpush1.bf16.msra.mxu0 %v200_v48  ;;  %v146_v5 = vld [vmem:[%s1034_s1 + $0x250] sm:$0xff]  ;;  %v79_v7 = vld [vmem:[%s1034_s1 + $0x38] sm:$0xff]  ;;  %v141_v8 = vld [vmem:[%s1034_s1 + $0x228] sm:$0xff]  ;;  %v196_v10 = vpack.c.bf16 %v82_v2, %v80_v1 }
  0x12   :  { %358 = vmatpush1.bf16.msra.mxu1 %v232_v51  ;;  %276 = vmatprep.subr.bf16.mxu0 %v199_v52  ;;  %v143_v9 = vld [vmem:[%s1034_s1 + $0x238] sm:$0xff]  ;;  %v228_v11 = vpack.c.bf16 %v146_v5, %v144_v3  ;;  %v195_v12 = vpack.c.bf16 %v79_v7, %v77_v6  ;;  %v76_v13 = vld [vmem:[%s1034_s1 + $0x20] sm:$0xff]  ;;  %v78_v14 = vld [vmem:[%s1034_s1 + $0x30] sm:$0xff] }
  0x13   :  { %359 = vmatprep.subr.bf16.mxu1 %v231_v56  ;;  %v140_v15 = vld [vmem:[%s1034_s1 + $0x220] sm:$0xff]  ;;  %v227_v16 = vpack.c.bf16 %v143_v9, %v141_v8  ;;  %v142_v17 = vld [vmem:[%s1034_s1 + $0x230] sm:$0xff]  ;;  %v73_v18 = vld [vmem:[%s1034_s1 + $0x8] sm:$0xff]  ;;  %v194_v22 = vpack.c.bf16 %v78_v14, %v76_v13 }
  0x14   :  { %v75_v19 = vld [vmem:[%s1034_s1 + $0x18] sm:$0xff]  ;;  %v137_v20 = vld [vmem:[%s1034_s1 + $0x208] sm:$0xff]  ;;  %v226_v23 = vpack.c.bf16 %v142_v17, %v140_v15  ;;  %v72_v25 = vld [vmem:[%s1034_s1] sm:$0xff] }
  0x15   :  { %277 = vmatpush1.bf16.msra.mxu0 %v198_v62  ;;  %v139_v21 = vld [vmem:[%s1034_s1 + $0x218] sm:$0xff]  ;;  %v193_v24 = vpack.c.bf16 %v75_v19, %v73_v18  ;;  %v74_v26 = vld [vmem:[%s1034_s1 + $0x10] sm:$0xff]  ;;  %v136_v27 = vld [vmem:[%s1034_s1 + $0x200] sm:$0xff] }
  0x16   :  { %360 = vmatpush1.bf16.msra.mxu1 %v230_v63  ;;  %278 = vmatprep.subr.bf16.mxu0 %v197_v0  ;;  %v225_v28 = vpack.c.bf16 %v139_v21, %v137_v20  ;;  %v138_v29 = vld [vmem:[%s1034_s1 + $0x210] sm:$0xff]  ;;  %v133_v30 = vld [vmem:[%s1034_s1 + $0x1e8] sm:$0xff]  ;;  %v135_v31 = vld [vmem:[%s1034_s1 + $0x1f8] sm:$0xff]  ;;  %v192_v34 = vpack.c.bf16 %v74_v26, %v72_v25 }
  0x17   :  { %361 = vmatprep.subr.bf16.mxu1 %v229_v4  ;;  %v189_v32 = vld [vmem:[%s1034_s1 + $0x3a8] sm:$0xff]  ;;  %v191_v33 = vld [vmem:[%s1034_s1 + $0x3b8] sm:$0xff]  ;;  %v224_v35 = vpack.c.bf16 %v138_v29, %v136_v27  ;;  %v223_v36 = vpack.c.bf16 %v135_v31, %v133_v30  ;;  %v132_v37 = vld [vmem:[%s1034_s1 + $0x1e0] sm:$0xff] }
  0x18   :  { %v134_v38 = vld [vmem:[%s1034_s1 + $0x1f0] sm:$0xff]  ;;  %v188_v39 = vld [vmem:[%s1034_s1 + $0x3a0] sm:$0xff]  ;;  %v251_v40 = vpack.c.bf16 %v191_v33, %v189_v32  ;;  %v129_v42 = vld [vmem:[%s1034_s1 + $0x1c8] sm:$0xff] }
  0x19   :  { %279 = vmatpush1.bf16.msra.mxu0 %v196_v10  ;;  %v190_v41 = vld [vmem:[%s1034_s1 + $0x3b0] sm:$0xff]  ;;  %v131_v43 = vld [vmem:[%s1034_s1 + $0x1d8] sm:$0xff]  ;;  %v185_v44 = vld [vmem:[%s1034_s1 + $0x388] sm:$0xff]  ;;  %v222_v46 = vpack.c.bf16 %v134_v38, %v132_v37 }
  0x1a   :  { %362 = vmatpush1.bf16.msra.mxu1 %v228_v11  ;;  %280 = vmatprep.subr.bf16.mxu0 %v195_v12  ;;  %v187_v45 = vld [vmem:[%s1034_s1 + $0x398] sm:$0xff]  ;;  %v250_v47 = vpack.c.bf16 %v190_v41, %v188_v39  ;;  %v221_v48 = vpack.c.bf16 %v131_v43, %v129_v42  ;;  %v128_v49 = vld [vmem:[%s1034_s1 + $0x1c0] sm:$0xff]  ;;  %v130_v50 = vld [vmem:[%s1034_s1 + $0x1d0] sm:$0xff] }
  0x1b   :  { %363 = vmatprep.subr.bf16.mxu1 %v227_v16  ;;  %v184_v51 = vld [vmem:[%s1034_s1 + $0x380] sm:$0xff]  ;;  %v249_v52 = vpack.c.bf16 %v187_v45, %v185_v44  ;;  %v186_v53 = vld [vmem:[%s1034_s1 + $0x390] sm:$0xff]  ;;  %v125_v54 = vld [vmem:[%s1034_s1 + $0x1a8] sm:$0xff]  ;;  %v220_v58 = vpack.c.bf16 %v130_v50, %v128_v49 }
  0x1c   :  { %v127_v55 = vld [vmem:[%s1034_s1 + $0x1b8] sm:$0xff]  ;;  %v181_v56 = vld [vmem:[%s1034_s1 + $0x368] sm:$0xff]  ;;  %v124_v59 = vld [vmem:[%s1034_s1 + $0x1a0] sm:$0xff]  ;;  %v248_v60 = vpack.c.bf16 %v186_v53, %v184_v51 }
  0x1d   :  { %281 = vmatpush1.bf16.msra.mxu0 %v194_v22  ;;  %v183_v57 = vld [vmem:[%s1034_s1 + $0x378] sm:$0xff]  ;;  %v219_v61 = vpack.c.bf16 %v127_v55, %v125_v54  ;;  %v126_v62 = vld [vmem:[%s1034_s1 + $0x1b0] sm:$0xff]  ;;  %v180_v63 = vld [vmem:[%s1034_s1 + $0x360] sm:$0xff] }
  0x1e   :  { %364 = vmatpush1.bf16.msra.mxu1 %v226_v23  ;;  %282 = vmatprep.subr.bf16.mxu0 %v193_v24  ;;  %v182_v0 = vld [vmem:[%s1034_s1 + $0x370] sm:$0xff]  ;;  %v247_v1 = vpack.c.bf16 %v183_v57, %v181_v56  ;;  %v121_v2 = vld [vmem:[%s1034_s1 + $0x188] sm:$0xff]  ;;  %v123_v3 = vld [vmem:[%s1034_s1 + $0x198] sm:$0xff]  ;;  %v218_v8 = vpack.c.bf16 %v126_v62, %v124_v59 }
  0x1f   :  { %365 = vmatprep.subr.bf16.mxu1 %v225_v28  ;;  %v15_v4 = vld [vmem:[%s1035_s0 + $0x18] sm:$0xff]  ;;  %v177_v5 = vld [vmem:[%s1034_s1 + $0x348] sm:$0xff]  ;;  %v120_v9 = vld [vmem:[%s1034_s1 + $0x180] sm:$0xff]  ;;  %v246_v12 = vpack.c.bf16 %v182_v0, %v180_v63  ;;  %v217_v13 = vpack.c.bf16 %v123_v3, %v121_v2 }
  0x20   :  { %v179_v6 = vld [vmem:[%s1034_s1 + $0x358] sm:$0xff]  ;;  %v122_v10 = vld [vmem:[%s1034_s1 + $0x190] sm:$0xff]  ;;  %v176_v14 = vld [vmem:[%s1034_s1 + $0x340] sm:$0xff] }
  0x21   :  { %283 = vmatpush1.bf16.msra.mxu0 %v192_v34  ;;  %v19_v7 = vld [vmem:[%s1035_s0 + $0x38] sm:$0xff]  ;;  %v13_v15 = vld [vmem:[%s1035_s0 + $0x8] sm:$0xff]  ;;  %v245_v17 = vpack.c.bf16 %v179_v6, %v177_v5  ;;  %v178_v18 = vld [vmem:[%s1034_s1 + $0x350] sm:$0xff]  ;;  %v216_v24 = vpack.c.bf16 %v122_v10, %v120_v9 }
  0x22   :  { %366 = vmatpush1.bf16.msra.mxu1 %v224_v35  ;;  %284 = vmatprep.subr.bf16.mxu0 %v223_v36  ;;  %v55_v11 = vpack.c.bf16 %v19_v7, %v15_v4  ;;  %v17_v16 = vld [vmem:[%s1035_s0 + $0x28] sm:$0xff]  ;;  %v119_v20 = vld [vmem:[%s1034_s1 + $0x178] sm:$0xff]  ;;  %v244_v25 = vpack.c.bf16 %v178_v18, %v176_v14  ;;  %v116_v27 = vld [vmem:[%s1034_s1 + $0x160] sm:$0xff] }
  0x23   :  { %371 = vmatprep.subr.bf16.mxu1 %v251_v40  ;;  %v117_v19 = vld [vmem:[%s1034_s1 + $0x168] sm:$0xff]  ;;  %v53_v21 = vpack.c.bf16 %v17_v16, %v13_v15  ;;  %v175_v23 = vld [vmem:[%s1034_s1 + $0x338] sm:$0xff]  ;;  %v118_v28 = vld [vmem:[%s1034_s1 + $0x170] sm:$0xff] }
  0x24   :  { %459 = vmatprep.mubr.msk.bf16.mxu1 %vm252_vm0, %v55_v11  ;;  %v173_v22 = vld [vmem:[%s1034_s1 + $0x328] sm:$0xff]  ;;  %v215_v26 = vpack.c.bf16 %v119_v20, %v117_v19  ;;  %v172_v29 = vld [vmem:[%s1034_s1 + $0x320] sm:$0xff]  ;;  %v174_v31 = vld [vmem:[%s1034_s1 + $0x330] sm:$0xff]  ;;  %v214_v36 = vpack.c.bf16 %v118_v28, %v116_v27 }
  0x25   :  { %285 = vmatpush2.bf16.msra.mxu0 %v222_v46  ;;  %300 = vmatprep.mubr.bf16.mxu0 %v53_v21  ;;  %v243_v30 = vpack.c.bf16 %v175_v23, %v173_v22  ;;  %v113_v32 = vld [vmem:[%s1034_s1 + $0x148] sm:$0xff]  ;;  %v115_v33 = vld [vmem:[%s1034_s1 + $0x158] sm:$0xff]  ;;  %v242_v37 = vpack.c.bf16 %v174_v31, %v172_v29  ;;  %v112_v39 = vld [vmem:[%s1034_s1 + $0x140] sm:$0xff] }
  0x26   :  { %372 = vmatpush2.bf16.msra.mxu1 %v250_v47  ;;  %286 = vmatprep.subr.bf16.mxu0 %v221_v48  ;;  %v169_v34 = vld [vmem:[%s1034_s1 + $0x308] sm:$0xff]  ;;  %v171_v35 = vld [vmem:[%s1034_s1 + $0x318] sm:$0xff]  ;;  %v213_v38 = vpack.c.bf16 %v115_v33, %v113_v32  ;;  %v114_v40 = vld [vmem:[%s1034_s1 + $0x150] sm:$0xff] }
  0x27   :  { %373 = vmatprep.subr.bf16.mxu1 %v249_v52  ;;  %v168_v41 = vld [vmem:[%s1034_s1 + $0x300] sm:$0xff]  ;;  %v241_v42 = vpack.c.bf16 %v171_v35, %v169_v34  ;;  %v170_v43 = vld [vmem:[%s1034_s1 + $0x310] sm:$0xff]  ;;  %v109_v44 = vld [vmem:[%s1034_s1 + $0x128] sm:$0xff]  ;;  %v212_v46 = vpack.c.bf16 %v114_v40, %v112_v39 }
  0x28   :  { %v111_v45 = vld [vmem:[%s1034_s1 + $0x138] sm:$0xff]  ;;  %v108_v47 = vld [vmem:[%s1034_s1 + $0x120] sm:$0xff]  ;;  %v110_v48 = vld [vmem:[%s1034_s1 + $0x130] sm:$0xff]  ;;  %v240_v49 = vpack.c.bf16 %v170_v43, %v168_v41 }
  0x29   :  { %287 = vmatpush2.bf16.msra.mxu0 %v220_v58  ;;  %v211_v50 = vpack.c.bf16 %v111_v45, %v109_v44  ;;  %v14_v51 = vld [vmem:[%s1035_s0 + $0x10] sm:$0xff]  ;;  %v105_v53 = vld [vmem:[%s1034_s1 + $0x108] sm:$0xff]  ;;  %v107_v54 = vld [vmem:[%s1034_s1 + $0x118] sm:$0xff]  ;;  %v210_v57 = vpack.c.bf16 %v110_v48, %v108_v47 }
  0x2a   :  { %374 = vmatpush2.bf16.msra.mxu1 %v248_v60  ;;  %288 = vmatprep.subr.bf16.mxu0 %v219_v61  ;;  %v18_v52 = vld [vmem:[%s1035_s0 + $0x30] sm:$0xff]  ;;  %v23_v55 = vld [vmem:[%s1035_s0 + $0x58] sm:$0xff]  ;;  %v209_v59 = vpack.c.bf16 %v107_v54, %v105_v53  ;;  %v104_v60 = vld [vmem:[%s1034_s1 + $0x100] sm:$0xff] }
  0x2b   :  { %375 = vmatprep.subr.bf16.mxu1 %v247_v1  ;;  %v27_v56 = vld [vmem:[%s1035_s0 + $0x78] sm:$0xff]  ;;  %v54_v58 = vpack.c.bf16 %v18_v52, %v14_v51  ;;  %v106_v61 = vld [vmem:[%s1034_s1 + $0x110] sm:$0xff]  ;;  %v12_v0 = vld [vmem:[%s1035_s0] sm:$0xff] }
  0x2c   :  { %v59_v62 = vpack.c.bf16 %v27_v56, %v23_v55  ;;  %v208_v63 = vpack.c.bf16 %v106_v61, %v104_v60  ;;  %v16_v1 = vld [vmem:[%s1035_s0 + $0x20] sm:$0xff]  ;;  %v22_v2 = vld [vmem:[%s1035_s0 + $0x50] sm:$0xff]  ;;  %v21_v4 = vld [vmem:[%s1035_s0 + $0x48] sm:$0xff] }
  0x2d   :  { %289 = vmatpush2.bf16.msra.mxu0 %v218_v8  ;;  %v26_v3 = vld [vmem:[%s1035_s0 + $0x70] sm:$0xff]  ;;  %v25_v5 = vld [vmem:[%s1035_s0 + $0x68] sm:$0xff]  ;;  %v31_v6 = vld [vmem:[%s1035_s0 + $0x98] sm:$0xff]  ;;  %v52_v8 = vpack.c.bf16 %v16_v1, %v12_v0 }
  0x2e   :  { %376 = vmatpush2.bf16.msra.mxu1 %v246_v12  ;;  %290 = vmatprep.subr.bf16.mxu0 %v217_v13  ;;  %v35_v7 = vld [vmem:[%s1035_s0 + $0xb8] sm:$0xff]  ;;  %v58_v9 = vpack.c.bf16 %v26_v3, %v22_v2  ;;  %v57_v10 = vpack.c.bf16 %v25_v5, %v21_v4  ;;  %v20_v12 = vld [vmem:[%s1035_s0 + $0x40] sm:$0xff]  ;;  %v30_v14 = vld [vmem:[%s1035_s0 + $0x90] sm:$0xff] }
  0x2f   :  { %377 = vmatprep.subr.bf16.mxu1 %v245_v17  ;;  %v63_v11 = vpack.c.bf16 %v35_v7, %v31_v6  ;;  %v24_v13 = vld [vmem:[%s1035_s0 + $0x60] sm:$0xff]  ;;  %v34_v15 = vld [vmem:[%s1035_s0 + $0xb0] sm:$0xff]  ;;  %v29_v16 = vld [vmem:[%s1035_s0 + $0x88] sm:$0xff] }
  0x30   :  { %v33_v17 = vld [vmem:[%s1035_s0 + $0xa8] sm:$0xff]  ;;  %v39_v18 = vld [vmem:[%s1035_s0 + $0xd8] sm:$0xff]  ;;  %v56_v20 = vpack.c.bf16 %v24_v13, %v20_v12  ;;  %v62_v21 = vpack.c.bf16 %v34_v15, %v30_v14  ;;  %v42_v27 = vld [vmem:[%s1035_s0 + $0xf0] sm:$0xff] }
  0x31   :  { %291 = vmatpush2.bf16.msra.mxu0 %v216_v24  ;;  %v43_v19 = vld [vmem:[%s1035_s0 + $0xf8] sm:$0xff]  ;;  %v61_v22 = vpack.c.bf16 %v33_v17, %v29_v16  ;;  %v28_v24 = vld [vmem:[%s1035_s0 + $0x80] sm:$0xff]  ;;  %v37_v28 = vld [vmem:[%s1035_s0 + $0xc8] sm:$0xff] }
  0x32   :  { %378 = vmatpush2.bf16.msra.mxu1 %v244_v25  ;;  %292 = vmatprep.subr.bf16.mxu0 %v215_v26  ;;  %v67_v23 = vpack.c.bf16 %v43_v19, %v39_v18  ;;  %v32_v25 = vld [vmem:[%s1035_s0 + $0xa0] sm:$0xff]  ;;  %v38_v26 = vld [vmem:[%s1035_s0 + $0xd0] sm:$0xff]  ;;  %v41_v29 = vld [vmem:[%s1035_s0 + $0xe8] sm:$0xff] }
  0x33   :  { %379 = vmatprep.subr.bf16.mxu1 %v243_v30  ;;  %v47_v30 = vld [vmem:[%s1035_s0 + $0x118] sm:$0xff]  ;;  %v60_v32 = vpack.c.bf16 %v32_v25, %v28_v24  ;;  %v66_v33 = vpack.c.bf16 %v42_v27, %v38_v26  ;;  %v65_v34 = vpack.c.bf16 %v41_v29, %v37_v28  ;;  %v50_v39 = vld [vmem:[%s1035_s0 + $0x130] sm:$0xff]  ;;  %v45_v40 = vld [vmem:[%s1035_s0 + $0x108] sm:$0xff] }
  0x34   :  { %v51_v31 = vld [vmem:[%s1035_s0 + $0x138] sm:$0xff]  ;;  %v49_v41 = vld [vmem:[%s1035_s0 + $0x128] sm:$0xff]  ;;  %v44_v45 = vld [vmem:[%s1035_s0 + $0x100] sm:$0xff] }
  0x35   :  { %293 = vmatpush2.bf16.msra.mxu0 %v214_v36  ;;  %v71_v35 = vpack.c.bf16 %v51_v31, %v47_v30  ;;  %v36_v36 = vld [vmem:[%s1035_s0 + $0xc0] sm:$0xff]  ;;  %v69_v44 = vpack.c.bf16 %v49_v41, %v45_v40 }
  0x36   :  { %380 = vmatpush2.bf16.msra.mxu1 %v242_v37  ;;  %294 = vmatprep.subr.bf16.mxu0 %v213_v38  ;;  %v40_v37 = vld [vmem:[%s1035_s0 + $0xe0] sm:$0xff]  ;;  %v46_v38 = vld [vmem:[%s1035_s0 + $0x110] sm:$0xff] }
  0x37   :  { %381 = vmatprep.subr.bf16.mxu1 %v241_v42  ;;  %v64_v42 = vpack.c.bf16 %v40_v37, %v36_v36  ;;  %v70_v43 = vpack.c.bf16 %v50_v39, %v46_v38 }
  0x39   :  { %295 = vmatpush2.bf16.msra.mxu0 %v212_v46  ;;  %v48_v46 = vld [vmem:[%s1035_s0 + $0x120] sm:$0xff] }
  0x3a   :  { %382 = vmatpush2.bf16.msra.mxu1 %v240_v49  ;;  %296 = vmatprep.subr.bf16.mxu0 %v211_v50  ;;  %v68_v47 = vpack.c.bf16 %v48_v46, %v44_v45 }
  0x3d   :  { %297 = vmatpush2.bf16.msra.mxu0 %v210_v57  ;;  %384 = vmatmul.mubr.bf16.vlgmr.msra.gmra.mxu1 %v54_v58 }
  0x3e   :  { %298 = vmatprep.subr.bf16.mxu0 %v209_v59  ;;  %460 = vmatprep.mubr.msk.bf16.mxu1 %vm252_vm0, %v59_v62 }
  0x41   :  { %299 = vmatpush2.bf16.msra.mxu0 %v208_v63 }
  0x44   :  { %301 = vmatmul.mubr.bf16.vlgmr.msra.gmra.mxu0 %v52_v8 }
  0x45   :  { %394 = vmatmul.mubr.bf16.gmra.mxu1 %v58_v9  ;;  %310 = vmatprep.mubr.bf16.mxu0 %v57_v10 }
  0x46   :  { %461 = vmatprep.mubr.msk.bf16.mxu1 %vm252_vm0, %v63_v11 }
  0x4c   :  { %311 = vmatmul.mubr.bf16.gmra.mxu0 %v56_v20 }
  0x4d   :  { %404 = vmatmul.mubr.bf16.gmra.mxu1 %v62_v21  ;;  %320 = vmatprep.mubr.bf16.mxu0 %v61_v22 }
  0x4e   :  { %462 = vmatprep.mubr.msk.bf16.mxu1 %vm252_vm0, %v67_v23 }
  0x54   :  { %321 = vmatmul.mubr.bf16.gmra.mxu0 %v60_v32 }
  0x55   :  { %414 = vmatmul.mubr.bf16.gmra.mxu1 %v66_v33  ;;  %330 = vmatprep.mubr.bf16.mxu0 %v65_v34 }
  0x56   :  { %463 = vmatprep.mubr.msk.bf16.mxu1 %vm252_vm0, %v71_v35 }
  0x5c   :  { %331 = vmatmul.mubr.bf16.gmra.mxu0 %v64_v42 }
  0x5d   :  { %424 = vmatmul.mubr.bf16.gmra.mxu1 %v70_v43  ;;  %340 = vmatprep.mubr.bf16.mxu0 %v69_v44 }
  0x64   :  { %341 = vmatmul.mubr.bf16.gmra.mxu0 %v68_v47 }
  0xfd   :  { %v385_v48 = vpop.f32.mrf.mxu1 }
  0xff   :  { %v387_v49 = vpop.f32.mrf.mxu1 }
 0x101   :  { %v389_v50 = vpop.f32.mrf.mxu1 }
 0x103   :  { %v391_v51 = vpop.f32.mrf.mxu1 }
 0x104   :  { %v302_v52 = vpop.f32.mrf.mxu0 }
 0x105   :  { %v386_v53 = vadd.f32 %v385_v48, %v302_v52  ;;  %v395_v54 = vpop.f32.mrf.mxu1 }
 0x106   :  { %v304_v55 = vpop.f32.mrf.mxu0 }
 0x107   :  { %434 = vst [vmem:[%s1036_s2] sm:$0xff] %v386_v53  ;;  %v388_v56 = vadd.f32 %v387_v49, %v304_v55  ;;  %v397_v57 = vpop.f32.mrf.mxu1 }
 0x108   :  { %v306_v58 = vpop.f32.mrf.mxu0 }
 0x109   :  { %436 = vst.msk [vmem:[%s1036_s2 + $0x8] sm:$0xff] %vm435_vm1, %v388_v56  ;;  %v390_v59 = vadd.f32 %v389_v50, %v306_v58  ;;  %v399_v60 = vpop.f32.mrf.mxu1 }
 0x10a   :  { %v308_v61 = vpop.f32.mrf.mxu0 }
 0x10b   :  { %437 = vst [vmem:[%s1036_s2 + $0x10] sm:$0xff] %v390_v59  ;;  %v392_v62 = vadd.f32 %v391_v51, %v308_v61  ;;  %v401_v63 = vpop.f32.mrf.mxu1 }
 0x10c   :  { %v312_v0 = vpop.f32.mrf.mxu0 }
 0x10d   :  { %438 = vst.msk [vmem:[%s1036_s2 + $0x18] sm:$0xff] %vm435_vm1, %v392_v62  ;;  %v396_v1 = vadd.f32 %v395_v54, %v312_v0  ;;  %v405_v2 = vpop.f32.mrf.mxu1 }
 0x10e   :  { %v314_v3 = vpop.f32.mrf.mxu0 }
 0x10f   :  { %439 = vst [vmem:[%s1036_s2 + $0x20] sm:$0xff] %v396_v1  ;;  %v398_v4 = vadd.f32 %v397_v57, %v314_v3  ;;  %v407_v5 = vpop.f32.mrf.mxu1 }
 0x110   :  { %v316_v6 = vpop.f32.mrf.mxu0 }
 0x111   :  { %440 = vst.msk [vmem:[%s1036_s2 + $0x28] sm:$0xff] %vm435_vm1, %v398_v4  ;;  %v400_v7 = vadd.f32 %v399_v60, %v316_v6  ;;  %v409_v8 = vpop.f32.mrf.mxu1 }
 0x112   :  { %v318_v9 = vpop.f32.mrf.mxu0 }
 0x113   :  { %441 = vst [vmem:[%s1036_s2 + $0x30] sm:$0xff] %v400_v7  ;;  %v402_v10 = vadd.f32 %v401_v63, %v318_v9  ;;  %v411_v11 = vpop.f32.mrf.mxu1 }
 0x114   :  { %v322_v12 = vpop.f32.mrf.mxu0 }
 0x115   :  { %442 = vst.msk [vmem:[%s1036_s2 + $0x38] sm:$0xff] %vm435_vm1, %v402_v10  ;;  %v406_v13 = vadd.f32 %v405_v2, %v322_v12  ;;  %v415_v14 = vpop.f32.mrf.mxu1 }
 0x116   :  { %v324_v15 = vpop.f32.mrf.mxu0 }
 0x117   :  { %443 = vst [vmem:[%s1036_s2 + $0x40] sm:$0xff] %v406_v13  ;;  %v408_v16 = vadd.f32 %v407_v5, %v324_v15  ;;  %v417_v17 = vpop.f32.mrf.mxu1 }
 0x118   :  { %v326_v18 = vpop.f32.mrf.mxu0 }
 0x119   :  { %444 = vst.msk [vmem:[%s1036_s2 + $0x48] sm:$0xff] %vm435_vm1, %v408_v16  ;;  %v410_v19 = vadd.f32 %v409_v8, %v326_v18  ;;  %v419_v20 = vpop.f32.mrf.mxu1 }
 0x11a   :  { %v328_v21 = vpop.f32.mrf.mxu0 }
 0x11b   :  { %445 = vst [vmem:[%s1036_s2 + $0x50] sm:$0xff] %v410_v19  ;;  %v412_v22 = vadd.f32 %v411_v11, %v328_v21  ;;  %v421_v23 = vpop.f32.mrf.mxu1 }
 0x11c   :  { %v332_v24 = vpop.f32.mrf.mxu0 }
 0x11d   :  { %446 = vst.msk [vmem:[%s1036_s2 + $0x58] sm:$0xff] %vm435_vm1, %v412_v22  ;;  %v416_v25 = vadd.f32 %v415_v14, %v332_v24  ;;  %v425_v27 = vpop.f32.mrf.mxu1 }
 0x11e   :  { %v334_v26 = vpop.f32.mrf.mxu0 }
 0x11f   :  { %447 = vst [vmem:[%s1036_s2 + $0x60] sm:$0xff] %v416_v25  ;;  %v418_v28 = vadd.f32 %v417_v17, %v334_v26  ;;  %v427_v31 = vpop.f32.mrf.mxu1 }
 0x120   :  { %v336_v29 = vpop.f32.mrf.mxu0 }
 0x121   :  { %448 = vst.msk [vmem:[%s1036_s2 + $0x68] sm:$0xff] %vm435_vm1, %v418_v28  ;;  %v420_v30 = vadd.f32 %v419_v20, %v336_v29  ;;  %v429_v36 = vpop.f32.mrf.mxu1 }
 0x122   :  { %v338_v32 = vpop.f32.mrf.mxu0 }
 0x123   :  { %449 = vst [vmem:[%s1036_s2 + $0x70] sm:$0xff] %v420_v30  ;;  %v422_v33 = vadd.f32 %v421_v23, %v338_v32  ;;  %v431_v41 = vpop.f32.mrf.mxu1 }
 0x124   :  { %v342_v34 = vpop.f32.mrf.mxu0 }
 0x125   :  { %450 = vst.msk [vmem:[%s1036_s2 + $0x78] sm:$0xff] %vm435_vm1, %v422_v33  ;;  %v426_v35 = vadd.f32 %v425_v27, %v342_v34 }
 0x126   :  { %v344_v37 = vpop.f32.mrf.mxu0 }
 0x127   :  { %451 = vst [vmem:[%s1036_s2 + $0x80] sm:$0xff] %v426_v35  ;;  %v428_v38 = vadd.f32 %v427_v31, %v344_v37 }
 0x128   :  { %v346_v39 = vpop.f32.mrf.mxu0 }
 0x129   :  { %452 = vst.msk [vmem:[%s1036_s2 + $0x88] sm:$0xff] %vm435_vm1, %v428_v38  ;;  %v430_v40 = vadd.f32 %v429_v36, %v346_v39 }
 0x12a   :  { %v348_v42 = vpop.f32.mrf.mxu0 }
 0x12b   :  { %453 = vst [vmem:[%s1036_s2 + $0x90] sm:$0xff] %v430_v40  ;;  %v432_v43 = vadd.f32 %v431_v41, %v348_v42 }
 0x12d   :  { %454 = vst.msk [vmem:[%s1036_s2 + $0x98] sm:$0xff] %vm435_vm1, %v432_v43 }

</bundles_post_ra>
